<compile_context>
chip_gen: v7x
topology: tpu7x:2x2x1
jax: 0.10.0
libtpu: 0.0.40
codegen_flags: <defaults>
</compile_context>

<pallas_src>
import functools

import jax
import jax.numpy as jnp
from jax.experimental import pallas as pl
from jax.experimental.pallas import tpu as pltpu


def _round_up(x, m):
    return (x + m - 1) // m * m


def _gconv_matmul_kernel(x_ref, w_ref, o_ref):
    # x_ref: (Gb, Mp, K) bf16   w_ref: (Gb, K, Cgop) bf16   o_ref: (Gb, Mp, Cgop) f32
    gb = x_ref.shape[0]

    def body(g, carry):
        o_ref[g] = jnp.dot(
            x_ref[g], w_ref[g], preferred_element_type=jnp.float32
        ).astype(o_ref.dtype)
        return carry

    jax.lax.fori_loop(0, gb, body, None, unroll=True)


def _choose_group_blocking(groups, bytes_per_group, budget=10 * 1024 * 1024):
    """Pick (group_block gb, padded group count gp) with gp % gb == 0.

    Keeps the grid length even (v7x has 2 TensorCores on the 'parallel' axis)
    and bounds the per-step block footprint so double-buffering stays well
    inside the scoped VMEM limit on every generation.
    """
    if groups <= 1:
        return 1, max(groups, 1)
    gb = max(1, min((groups + 1) // 2, budget // max(1, bytes_per_group)))
    steps = pl.cdiv(groups, gb)
    if steps % 2 == 1 and steps > 1:
        steps += 1
    return gb, steps * gb


def grouped_conv2d_s2_p1(x_nchw, w_oihw, groups):
    """Equivalent of nn.Conv2d(C, C_out, 3, stride=2, padding=1, groups, bias=False)."""
    n, c, h, w = x_nchw.shape
    c_out, cg_in, kh, kw = w_oihw.shape
    assert c % groups == 0 and c_out % groups == 0 and cg_in == c // groups
    cg = c // groups
    cgo = c_out // groups
    stride, pad = 2, 1
    ho = (h + 2 * pad - kh) // stride + 1
    wo = (w + 2 * pad - kw) // stride + 1

    # Lane-dense padded per-group channel widths.
    cgp = _round_up(cg, 128)
    cgop = _round_up(cgo, 128)
    k = kh * kw * cgp
    m = n * ho * wo
    mp = _round_up(m, 8)

    # ---------- wrapper-side im2col: 9 taps fused into one contraction -------
    x_pad = jnp.pad(x_nchw, ((0, 0), (0, 0), (pad, pad), (pad, pad)))
    taps = []
    for ky in range(kh):
        for kx in range(kw):
            taps.append(
                x_pad[:, :, ky:ky + stride * ho:stride, kx:kx + stride * wo:stride]
            )
    # (T, N, C, Ho, Wo) -> (T, N, G, Cg, Ho, Wo), zero-pad Cg -> Cgp
    patches = jnp.stack(taps, axis=0).reshape(kh * kw, n, groups, cg, ho, wo)
    patches = jnp.pad(
        patches, ((0, 0), (0, 0), (0, 0), (0, cgp - cg), (0, 0), (0, 0))
    )
    # -> (G, N, Ho, Wo, T, Cgp) -> (G, M, K); contraction order = (ky, kx, cin)
    x_g = patches.transpose(2, 1, 4, 5, 0, 3).reshape(groups, m, k)

    # Weights: (C_out, Cg_in, KH, KW) -> (G, Cgo, Cg_in, KH, KW), pad channels.
    w_g = w_oihw.reshape(groups, cgo, cg_in, kh, kw)
    w_g = jnp.pad(w_g, ((0, 0), (0, cgop - cgo), (0, cgp - cg_in), (0, 0), (0, 0)))
    # -> (G, KH, KW, Cgp, Cgop) -> (G, K, Cgop); same contraction order as x_g.
    w_g = w_g.transpose(0, 3, 4, 2, 1).reshape(groups, k, cgop)

    # ---------- group blocking: few large grid steps, even grid length -------
    bytes_per_group = (mp * k + k * cgop) * 2 + mp * cgop * 4  # bf16 ins, f32 out
    gb, gp = _choose_group_blocking(groups, bytes_per_group)

    x_g = jnp.pad(x_g, ((0, gp - groups), (0, mp - m), (0, 0))).astype(jnp.bfloat16)
    w_g = jnp.pad(w_g, ((0, gp - groups), (0, 0), (0, 0))).astype(jnp.bfloat16)

    out_g = pl.pallas_call(
        _gconv_matmul_kernel,
        out_shape=jax.ShapeDtypeStruct((gp, mp, cgop), jnp.float32),
        grid_spec=pltpu.PrefetchScalarGridSpec(
            num_scalar_prefetch=0,
            grid=(gp // gb,),
            in_specs=[
                pl.BlockSpec((gb, mp, k), lambda i: (i, 0, 0)),
                pl.BlockSpec((gb, k, cgop), lambda i: (i, 0, 0)),
            ],
            out_specs=pl.BlockSpec((gb, mp, cgop), lambda i: (i, 0, 0)),
        ),
        compiler_params=pltpu.CompilerParams(
            dimension_semantics=("parallel",),
            vmem_limit_bytes=32 * 1024 * 1024,
        ),
    )(x_g, w_g)

    # (Gp, Mp, Cgop) -> strip padding -> (G, N, Ho, Wo, Cgo) -> (N, C_out, Ho, Wo)
    out = out_g[:groups, :m, :cgo].reshape(groups, n, ho, wo, cgo)
    out = out.transpose(1, 0, 4, 2, 3).reshape(n, c_out, ho, wo)
    # TODO(synk): if neighboring layers stay channels-last, skip this NCHW round-trip.
    return out.astype(x_nchw.dtype)


if __name__ == "__main__":
    # Small shapes consistent with the module's structure
    # (original: C=3024, groups=27, Cg=112, H=W=14, stride=2, pad=1; scaled down).
    N, G, CG, H, W = 2, 3, 32, 8, 8
    C = G * CG

    key = jax.random.PRNGKey(0)
    kx_key, kw_key = jax.random.split(key)
    x = jax.random.normal(kx_key, (N, C, H, W), dtype=jnp.float32)
    # PyTorch Conv2d weight layout: (out_channels, in_channels // groups, kH, kW)
    w = (jax.random.normal(kw_key, (C, CG, 3, 3), dtype=jnp.float32)
         * (1.0 / jnp.sqrt(CG * 9.0)))

    conv = jax.jit(functools.partial(grouped_conv2d_s2_p1, groups=G))
    out = jax.block_until_ready(conv(x, w))

    # Reference: XLA's grouped convolution.
    ref = jax.lax.conv_general_dilated(
        x, w,
        window_strides=(2, 2),
        padding=((1, 1), (1, 1)),
        dimension_numbers=("NCHW", "OIHW", "NCHW"),
        feature_group_count=G,
    )
    ref = jax.block_until_ready(ref)

    assert out.shape == ref.shape, (out.shape, ref.shape)
    if not jnp.allclose(out, ref, atol=5e-2, rtol=5e-2):
        err = jnp.max(jnp.abs(out - ref))
        raise AssertionError(f"Pallas grouped conv mismatch vs XLA (max abs err={err})")

    print("KERNEL_OK")
</pallas_src>

<mosaic_0001>
module attributes {stable_mosaic.version = 11 : i64} {
  func.func @_gconv_matmul_kernel(%arg0: i32, %arg1: memref<2x32x1152xbf16, #tpu.memory_space<vmem>>, %arg2: memref<2x1152x128xbf16, #tpu.memory_space<vmem>>, %arg3: memref<2x32x128xf32, #tpu.memory_space<vmem>>) attributes {dimension_semantics = [#tpu.dimension_semantics<parallel>], iteration_bounds = array<i64: 2>, scalar_prefetch = 0 : i64, scratch_operands = 0 : i64, tpu.core_type = #tpu.core_type<tc>, window_params = [{transform_indices = @transform_0, window_bounds = array<i64: 2, 32, 1152>}, {transform_indices = @transform_1, window_bounds = array<i64: 2, 1152, 128>}, {transform_indices = @transform_2, window_bounds = array<i64: 2, 32, 128>}]} {
    %c0_i32 = arith.constant 0 : i32
    %0 = arith.index_cast %c0_i32 : i32 to index
    %c0 = arith.constant 0 : index
    %c0_0 = arith.constant 0 : index
    %1 = vector.load %arg1[%0, %c0, %c0_0] : memref<2x32x1152xbf16, #tpu.memory_space<vmem>>, vector<1x32x1152xbf16>
    %2 = vector.shape_cast %1 : vector<1x32x1152xbf16> to vector<32x1152xbf16>
    %3 = arith.index_cast %c0_i32 : i32 to index
    %c0_1 = arith.constant 0 : index
    %c0_2 = arith.constant 0 : index
    %4 = vector.load %arg2[%3, %c0_1, %c0_2] : memref<2x1152x128xbf16, #tpu.memory_space<vmem>>, vector<1x1152x128xbf16>
    %5 = vector.shape_cast %4 : vector<1x1152x128xbf16> to vector<1152x128xbf16>
    %cst = arith.constant dense<0.000000e+00> : vector<32x128xf32>
    %6 = tpu.matmul %2, %5, %cst {dimension_numbers = #tpu.dot_dimension_numbers<[1], [0], [0], [1], [0, 0, 1, 1], [], []>} : vector<32x1152xbf16>, vector<1152x128xbf16>, vector<32x128xf32> -> vector<32x128xf32>
    %7 = arith.index_cast %c0_i32 : i32 to index
    %c0_3 = arith.constant 0 : index
    %c0_4 = arith.constant 0 : index
    %8 = vector.load %arg3[%7, %c0_3, %c0_4] : memref<2x32x128xf32, #tpu.memory_space<vmem>>, vector<1x32x128xf32>
    %9 = vector.shape_cast %8 : vector<1x32x128xf32> to vector<32x128xf32>
    %10 = vector.shape_cast %6 : vector<32x128xf32> to vector<1x32x128xf32>
    tpu.vector_store %arg3[%7, %c0_3, %c0_4], %10 {strides = array<i32>} : memref<2x32x128xf32, #tpu.memory_space<vmem>>, vector<1x32x128xf32>,
    %c1_i32 = arith.constant 1 : i32
    %11 = arith.index_cast %c1_i32 : i32 to index
    %c0_5 = arith.constant 0 : index
    %c0_6 = arith.constant 0 : index
    %12 = vector.load %arg1[%11, %c0_5, %c0_6] : memref<2x32x1152xbf16, #tpu.memory_space<vmem>>, vector<1x32x1152xbf16>
    %13 = vector.shape_cast %12 : vector<1x32x1152xbf16> to vector<32x1152xbf16>
    %14 = arith.index_cast %c1_i32 : i32 to index
    %c0_7 = arith.constant 0 : index
    %c0_8 = arith.constant 0 : index
    %15 = vector.load %arg2[%14, %c0_7, %c0_8] : memref<2x1152x128xbf16, #tpu.memory_space<vmem>>, vector<1x1152x128xbf16>
    %16 = vector.shape_cast %15 : vector<1x1152x128xbf16> to vector<1152x128xbf16>
    %cst_9 = arith.constant dense<0.000000e+00> : vector<32x128xf32>
    %17 = tpu.matmul %13, %16, %cst_9 {dimension_numbers = #tpu.dot_dimension_numbers<[1], [0], [0], [1], [0, 0, 1, 1], [], []>} : vector<32x1152xbf16>, vector<1152x128xbf16>, vector<32x128xf32> -> vector<32x128xf32>
    %18 = arith.index_cast %c1_i32 : i32 to index
    %c0_10 = arith.constant 0 : index
    %c0_11 = arith.constant 0 : index
    %19 = vector.load %arg3[%18, %c0_10, %c0_11] : memref<2x32x128xf32, #tpu.memory_space<vmem>>, vector<1x32x128xf32>
    %20 = vector.shape_cast %19 : vector<1x32x128xf32> to vector<32x128xf32>
    %21 = vector.shape_cast %17 : vector<32x128xf32> to vector<1x32x128xf32>
    tpu.vector_store %arg3[%18, %c0_10, %c0_11], %21 {strides = array<i32>} : memref<2x32x128xf32, #tpu.memory_space<vmem>>, vector<1x32x128xf32>,
    %c2_i32 = arith.constant 2 : i32
    return
  }
  func.func @transform_0(%arg0: i32) -> (i32, i32, i32) {
    %c0_i32 = arith.constant 0 : i32
    %c0_i32_0 = arith.constant 0 : i32
    %c0_i32_1 = arith.constant 0 : i32
    return %arg0, %c0_i32, %c0_i32_0 : i32, i32, i32
  }
  func.func @transform_1(%arg0: i32) -> (i32, i32, i32) {
    %c0_i32 = arith.constant 0 : i32
    %c0_i32_0 = arith.constant 0 : i32
    %c0_i32_1 = arith.constant 0 : i32
    return %arg0, %c0_i32, %c0_i32_0 : i32, i32, i32
  }
  func.func @transform_2(%arg0: i32) -> (i32, i32, i32) {
    %c0_i32 = arith.constant 0 : i32
    %c0_i32_0 = arith.constant 0 : i32
    %c0_i32_1 = arith.constant 0 : i32
    return %arg0, %c0_i32, %c0_i32_0 : i32, i32, i32
  }
}

</mosaic_0001>

<bundles_post_ra>
// kernel: grouped_conv2d_s2_p1.1
= control target key start
LH: loop header
LB: loop body
LE: loop exit
PB: predicated region body
PF: predicated region fallthrough
CT: control target
= control target key end

     0   :  { %s3001_s9 = smov 0   ;;  %s3220_s0 = inlined_call_operand.vmem [shape: bf16[4,32,1152], index: 0, kind: input, shape index: {}]   ;;  %s3221_s1 = inlined_call_operand.vmem [shape: bf16[4,1152,128], index: 1, kind: input, shape index: {}]   ;;  %s3222_s2 = inlined_call_operand.vmem [shape: f32[4,32,128], index: 2, kind: output, shape index: {}]  }
   0x1 LB: > { %s2125_s10 = sadd.s32 4294967295, %s2984_s9   ;;  %p2129_p0 = scmp.ge.s32.totalorder %s2984_s9, 1  ;;  %s2984_s9 = sphi %s3001_s9, %s12_s9  }
   0x2   : > { %p126_p1 = scmp.lt.s32.totalorder %s2984_s9, 3 }
   0x4   : > { %p127_p2 = pnand %p2129_p0, %p126_p1 }
   0x5   : > { %s2130_s11 = sshll.u32 (!%p127_p2), %s2125_s10, 1 }
   0x6   : > { %130 = sbr.rel (%p127_p2) target bundleno = 409 (0x199), region = 28  ;;  %p157_p3 = scmp.lt.s32.totalorder (!%p127_p2), %s2130_s11, 3 }
   0xd   : > { %s3224_s11 = smov (!%p157_p3, %s2130_s11), 3 }
   0xe   : > { %s2773_s12 = smul.u32 576, %s3224_s11  ;;  %s2487_s20 = sshll.u32 %s3224_s11, 5 }
   0xf   : > { %s2772_s16 = smul.u32 144, %s3224_s11  ;;  %s3207_s23 = scalar_lea.vmem %s3222_s2, %s2487_s20 }
  0x10   : > { %s3015_s15 = scalar_lea.vmem %s3221_s1, %s2773_s12 }
  0x11   : > { %v2782_v0 = vld [vmem:[%s3015_s15 + $0x40] sm:$0xff]   ;;  %v2786_v4 = vld [vmem:[%s3015_s15 + $0x48] sm:$0xff]   ;;  %v2790_v8 = vld [vmem:[%s3015_s15 + $0x50] sm:$0xff]   ;;  %s3051_s19 = scalar_lea.vmem %s3220_s0, %s2772_s16 }
  0x12   : > { %v2783_v1 = vld [vmem:[%s3015_s15 + $0xc0] sm:$0xff]   ;;  %2488 = vmatprep.subr.bf16.mxu0 %v2782_v0  ;;  %v2787_v5 = vld [vmem:[%s3015_s15 + $0xc8] sm:$0xff]   ;;  %v2791_v9 = vld [vmem:[%s3015_s15 + $0xd0] sm:$0xff]  }
  0x13   : > { %v2784_v2 = vld [vmem:[%s3015_s15] sm:$0xff]   ;;  %2516 = vmatprep.subr.bf16.mxu1 %v2783_v1  ;;  %v2788_v6 = vld [vmem:[%s3015_s15 + $0x8] sm:$0xff]   ;;  %v2792_v10 = vld [vmem:[%s3015_s15 + $0x10] sm:$0xff]  }
  0x14   : > { %v2785_v3 = vld [vmem:[%s3015_s15 + $0x80] sm:$0xff]   ;;  %2489 = vmatpush3.bf16.msra.mxu0 %v2784_v2  ;;  %v2789_v7 = vld [vmem:[%s3015_s15 + $0x88] sm:$0xff]   ;;  %v2793_v11 = vld [vmem:[%s3015_s15 + $0x90] sm:$0xff]  }
  0x15   : > { %2517 = vmatpush3.bf16.msra.mxu1 %v2785_v3  ;;  %2490 = vmatprep.subr.bf16.mxu0 %v2786_v4  ;;  %v2794_v12 = vld [vmem:[%s3015_s15 + $0x58] sm:$0xff]   ;;  %v2798_v16 = vld [vmem:[%s3015_s15 + $0x60] sm:$0xff]   ;;  %v2802_v20 = vld [vmem:[%s3015_s15 + $0x68] sm:$0xff]  }
  0x16   : > { %2518 = vmatprep.subr.bf16.mxu1 %v2787_v5  ;;  %v2795_v13 = vld [vmem:[%s3015_s15 + $0xd8] sm:$0xff]   ;;  %v2799_v17 = vld [vmem:[%s3015_s15 + $0xe0] sm:$0xff]   ;;  %v2803_v21 = vld [vmem:[%s3015_s15 + $0xe8] sm:$0xff]  }
  0x17   : > { %v2796_v14 = vld [vmem:[%s3015_s15 + $0x18] sm:$0xff]   ;;  %v2800_v18 = vld [vmem:[%s3015_s15 + $0x20] sm:$0xff]   ;;  %v2804_v22 = vld [vmem:[%s3015_s15 + $0x28] sm:$0xff]  }
  0x18   : > { %2491 = vmatpush3.bf16.msra.mxu0 %v2788_v6  ;;  %v2797_v15 = vld [vmem:[%s3015_s15 + $0x98] sm:$0xff]   ;;  %v2801_v19 = vld [vmem:[%s3015_s15 + $0xa0] sm:$0xff]   ;;  %v2805_v23 = vld [vmem:[%s3015_s15 + $0xa8] sm:$0xff]  }
  0x19   : > { %2519 = vmatpush3.bf16.msra.mxu1 %v2789_v7  ;;  %2492 = vmatprep.subr.bf16.mxu0 %v2790_v8  ;;  %v2806_v24 = vld [vmem:[%s3015_s15 + $0x70] sm:$0xff]   ;;  %v2810_v28 = vld [vmem:[%s3015_s15 + $0x78] sm:$0xff]   ;;  %v2814_v32 = vld [vmem:[%s3051_s19] ss:$36 sps:$4 sm:$0xff]  }
  0x1a   : > { %2520 = vmatprep.subr.bf16.mxu1 %v2791_v9  ;;  %v2807_v25 = vld [vmem:[%s3015_s15 + $0xf0] sm:$0xff]   ;;  %v2811_v29 = vld [vmem:[%s3015_s15 + $0xf8] sm:$0xff]   ;;  %v2816_v33 = vld [vmem:[%s3051_s19 + $0x4] ss:$36 sps:$4 sm:$0xff]  }
  0x1b   : > { %v2808_v26 = vld [vmem:[%s3015_s15 + $0x30] sm:$0xff]   ;;  %v2812_v30 = vld [vmem:[%s3015_s15 + $0x38] sm:$0xff]   ;;  %v2817_v34 = vld [vmem:[%s3051_s19 + $0x8] ss:$36 sps:$4 sm:$0xff]   ;;  %898 = vmatprep.mubr.bf16.mxu0 %v2816_v33 }
  0x1c   : > { %2493 = vmatpush3.bf16.msra.mxu0 %v2792_v10  ;;  %v2809_v27 = vld [vmem:[%s3015_s15 + $0xb0] sm:$0xff]   ;;  %v2813_v31 = vld [vmem:[%s3015_s15 + $0xb8] sm:$0xff]   ;;  %v2820_v36 = vld [vmem:[%s3015_s15 + $0x140] sm:$0xff]  }
  0x1d   : > { %2521 = vmatpush3.bf16.msra.mxu1 %v2793_v11  ;;  %2494 = vmatprep.subr.bf16.mxu0 %v2794_v12  ;;  %v2819_v35 = vld [vmem:[%s3051_s19 + $0xc] ss:$36 sps:$4 sm:$0xff]   ;;  %v2821_v37 = vld [vmem:[%s3015_s15 + $0x100] sm:$0xff]   ;;  %v2832_v48 = vld [vmem:[%s3015_s15 + $0x158] sm:$0xff]  }
  0x1e   : > { %2522 = vmatprep.subr.bf16.mxu1 %v2795_v13  ;;  %947 = vmatprep.mubr.bf16.mxu1 %v2819_v35  ;;  %v2822_v38 = vld [vmem:[%s3015_s15 + $0x1c0] sm:$0xff]   ;;  %v2824_v40 = vld [vmem:[%s3015_s15 + $0x148] sm:$0xff]   ;;  %v2828_v44 = vld [vmem:[%s3015_s15 + $0x150] sm:$0xff]  }
  0x1f   : > { %v2823_v39 = vld [vmem:[%s3015_s15 + $0x180] sm:$0xff]   ;;  %v2825_v41 = vld [vmem:[%s3015_s15 + $0x108] sm:$0xff]   ;;  %v2829_v45 = vld [vmem:[%s3015_s15 + $0x110] sm:$0xff]  }
  0x20   : > { %2495 = vmatpush3.bf16.msra.mxu0 %v2796_v14  ;;  %v2826_v42 = vld [vmem:[%s3015_s15 + $0x1c8] sm:$0xff]   ;;  %v2830_v46 = vld [vmem:[%s3015_s15 + $0x1d0] sm:$0xff]   ;;  %v2833_v49 = vld [vmem:[%s3015_s15 + $0x118] sm:$0xff]  }
  0x21   : > { %2523 = vmatpush3.bf16.msra.mxu1 %v2797_v15  ;;  %2496 = vmatprep.subr.bf16.mxu0 %v2798_v16  ;;  %v2827_v43 = vld [vmem:[%s3015_s15 + $0x188] sm:$0xff]   ;;  %v2831_v47 = vld [vmem:[%s3015_s15 + $0x190] sm:$0xff]   ;;  %v2834_v50 = vld [vmem:[%s3015_s15 + $0x1d8] sm:$0xff]  }
  0x22   : > { %2524 = vmatprep.subr.bf16.mxu1 %v2799_v17  ;;  %v2835_v51 = vld [vmem:[%s3015_s15 + $0x198] sm:$0xff]   ;;  %v2836_v52 = vld [vmem:[%s3015_s15 + $0x160] sm:$0xff]   ;;  %v2840_v56 = vld [vmem:[%s3015_s15 + $0x168] sm:$0xff]  }
  0x23   : > { %v2837_v53 = vld [vmem:[%s3015_s15 + $0x120] sm:$0xff]   ;;  %v2841_v57 = vld [vmem:[%s3051_s19 + $0x4c] ss:$36 sps:$4 sm:$0xff]   ;;  %v2843_v58 = vld [vmem:[%s3051_s19 + $0x54] ss:$36 sps:$4 sm:$0xff]  }
  0x24   : > { %2497 = vmatpush3.bf16.msra.mxu0 %v2800_v18  ;;  %v2838_v54 = vld [vmem:[%s3015_s15 + $0x1e0] sm:$0xff]   ;;  %v2845_v59 = vld [vmem:[%s3015_s15 + $0x128] sm:$0xff]   ;;  %v2847_v61 = vld [vmem:[%s3051_s19 + $0x50] ss:$36 sps:$4 sm:$0xff]  }
  0x25   : > { %2525 = vmatpush3.bf16.msra.mxu1 %v2801_v19  ;;  %2498 = vmatprep.subr.bf16.mxu0 %v2802_v20  ;;  %v2839_v55 = vld [vmem:[%s3015_s15 + $0x1a0] sm:$0xff]   ;;  %v2846_v60 = vld [vmem:[%s3051_s19 + $0x48] ss:$36 sps:$4 sm:$0xff]   ;;  %v2850_v0 = vld [vmem:[%s3015_s15 + $0x170] sm:$0xff]  }
  0x26   : > { %2526 = vmatprep.subr.bf16.mxu1 %v2803_v21  ;;  %v2848_v62 = vld [vmem:[%s3015_s15 + $0x1e8] sm:$0xff]   ;;  %v2851_v1 = vld [vmem:[%s3015_s15 + $0x130] sm:$0xff]   ;;  %v2854_v4 = vld [vmem:[%s3015_s15 + $0x178] sm:$0xff]  }
  0x27   : > { %v2849_v63 = vld [vmem:[%s3015_s15 + $0x1a8] sm:$0xff]   ;;  %v2852_v2 = vld [vmem:[%s3015_s15 + $0x1f0] sm:$0xff]   ;;  %v2855_v5 = vld [vmem:[%s3015_s15 + $0x138] sm:$0xff]  }
  0x28   : > { %2499 = vmatpush3.bf16.msra.mxu0 %v2804_v22  ;;  %v2853_v3 = vld [vmem:[%s3015_s15 + $0x1b0] sm:$0xff]   ;;  %v2856_v6 = vld [vmem:[%s3015_s15 + $0x1f8] sm:$0xff]   ;;  %v2861_v10 = vld [vmem:[%s3015_s15 + $0x200] sm:$0xff]  }
  0x29   : > { %2527 = vmatpush3.bf16.msra.mxu1 %v2805_v23  ;;  %2500 = vmatprep.subr.bf16.mxu0 %v2806_v24  ;;  %v2857_v7 = vld [vmem:[%s3051_s19 + $0x10] ss:$36 sps:$4 sm:$0xff]   ;;  %v2860_v9 = vld [vmem:[%s3015_s15 + $0x1b8] sm:$0xff]   ;;  %v2865_v13 = vld [vmem:[%s3015_s15 + $0x280] sm:$0xff]  }
  0x2a   : > { %2528 = vmatprep.subr.bf16.mxu1 %v2807_v25  ;;  %v2859_v8 = vld [vmem:[%s3051_s19 + $0x14] ss:$36 sps:$4 sm:$0xff]   ;;  %v2864_v12 = vld [vmem:[%s3051_s19 + $0x1c] ss:$36 sps:$4 sm:$0xff]   ;;  %v2867_v15 = vld [vmem:[%s3015_s15 + $0x208] sm:$0xff]  }
  0x2b   : > { %v2862_v11 = vld [vmem:[%s3051_s19 + $0x18] ss:$36 sps:$4 sm:$0xff]   ;;  %v2866_v14 = vld [vmem:[%s3015_s15 + $0x240] sm:$0xff]   ;;  %v2868_v16 = vld [vmem:[%s3015_s15 + $0x288] sm:$0xff]  }
  0x2c   : > { %2501 = vmatpush3.bf16.msra.mxu0 %v2808_v26  ;;  %v2869_v17 = vld [vmem:[%s3051_s19 + $0x5c] ss:$36 sps:$4 sm:$0xff]   ;;  %v2871_v18 = vld [vmem:[%s3015_s15 + $0x248] sm:$0xff]   ;;  %v2873_v20 = vld [vmem:[%s3015_s15 + $0x210] sm:$0xff]  }
  0x2d   : > { %2529 = vmatpush3.bf16.msra.mxu1 %v2809_v27  ;;  %2502 = vmatprep.subr.bf16.mxu0 %v2810_v28  ;;  %v2872_v19 = vld [vmem:[%s3051_s19 + $0x58] ss:$36 sps:$4 sm:$0xff]   ;;  %v2874_v21 = vld [vmem:[%s3051_s19 + $0x64] ss:$36 sps:$4 sm:$0xff]   ;;  %v2877_v23 = vld [vmem:[%s3015_s15 + $0x290] sm:$0xff]  }
  0x2e   : > { %2530 = vmatprep.subr.bf16.mxu1 %v2811_v29  ;;  %v2876_v22 = vld [vmem:[%s3051_s19 + $0x60] ss:$36 sps:$4 sm:$0xff]   ;;  %v2878_v24 = vld [vmem:[%s3015_s15 + $0x250] sm:$0xff]   ;;  %v2879_v25 = vld [vmem:[%s3015_s15 + $0x218] sm:$0xff]  }
  0x2f   : > { %v2880_v26 = vld [vmem:[%s3015_s15 + $0x298] sm:$0xff]   ;;  %v2882_v28 = vld [vmem:[%s3015_s15 + $0x220] sm:$0xff]   ;;  %v2887_v33 = vld [vmem:[%s3015_s15 + $0x268] sm:$0xff]  }
  0x30   : > { %2503 = vmatpush3.bf16.msra.mxu0 %v2812_v30  ;;  %v2881_v27 = vld [vmem:[%s3015_s15 + $0x258] sm:$0xff]   ;;  %v2883_v29 = vld [vmem:[%s3015_s15 + $0x2a0] sm:$0xff]   ;;  %v2889_v35 = vld [vmem:[%s3015_s15 + $0x2b0] sm:$0xff]  }
  0x31   : > { %2531 = vmatpush3.bf16.msra.mxu1 %v2813_v31  ;;  %2544 = vmatprep.subr.bf16.mxu0 %v2820_v36  ;;  %v2884_v30 = vld [vmem:[%s3015_s15 + $0x260] sm:$0xff]   ;;  %v2885_v31 = vld [vmem:[%s3015_s15 + $0x228] sm:$0xff]   ;;  %v2890_v36 = vld [vmem:[%s3015_s15 + $0x270] sm:$0xff]  }
  0x32   : > { %2572 = vmatprep.subr.bf16.mxu1 %v2822_v38  ;;  %v2892_v38 = vld [vmem:[%s3015_s15 + $0x2b8] sm:$0xff]  }
  0x33   : > { %899 = vmatmul.mubr.bf16.vlgmr.msra.gmra.mrb[0].mxu0 %v2814_v32  ;;  %v2886_v32 = vld [vmem:[%s3015_s15 + $0x2a8] sm:$0xff]  }
  0x34   : > { %948 = vmatmul.mubr.bf16.vlgmr.msra.gmra.mrb[0].mxu1 %v2817_v34  ;;  %2545 = vmatpush3.bf16.msra.mxu0 %v2821_v37  ;;  %v2888_v34 = vld [vmem:[%s3015_s15 + $0x230] sm:$0xff]   ;;  %v2891_v37 = vld [vmem:[%s3015_s15 + $0x238] sm:$0xff]  }
  0x35   : > { %2573 = vmatpush3.bf16.msra.mxu1 %v2823_v39  ;;  %2546 = vmatprep.subr.bf16.mxu0 %v2824_v40  ;;  %v2893_v39 = vld [vmem:[%s3051_s19 + $0x20] ss:$36 sps:$4 sm:$0xff]   ;;  %v2894_v40 = vld [vmem:[%s3015_s15 + $0x278] sm:$0xff]  }
  0x36   : > { %2574 = vmatprep.subr.bf16.mxu1 %v2826_v42  ;;  %906 = vmatprep.mubr.bf16.mxu0 %v2841_v57  ;;  %v2896_v42 = vld [vmem:[%s3015_s15 + $0x300] sm:$0xff]   ;;  %v2912_v57 = vld [vmem:[%s3015_s15 + $0x2d8] sm:$0xff]  }
  0x37   : > { %955 = vmatprep.mubr.bf16.mxu1 %v2843_v58  ;;  %v2913_v58 = vld [vmem:[%s3015_s15 + $0x398] sm:$0xff]  }
  0x38   : > { %2547 = vmatpush3.bf16.msra.mxu0 %v2825_v41  ;;  %v2895_v41 = vld [vmem:[%s3051_s19 + $0x68] ss:$36 sps:$4 sm:$0xff]  }
  0x39   : > { %2575 = vmatpush3.bf16.msra.mxu1 %v2827_v43  ;;  %2548 = vmatprep.subr.bf16.mxu0 %v2828_v44  ;;  %v2897_v43 = vld [vmem:[%s3015_s15 + $0x2c0] sm:$0xff]   ;;  %v2898_v44 = vld [vmem:[%s3051_s19 + $0x90] ss:$36 sps:$4 sm:$0xff]  }
  0x3a   : > { %2576 = vmatprep.subr.bf16.mxu1 %v2830_v46  ;;  %v2901_v46 = vld [vmem:[%s3015_s15 + $0x380] sm:$0xff]  }
  0x3b   : > { %907 = vmatmul.mubr.bf16.gmra.mrb[4].mxu0 %v2846_v60  ;;  %v2915_v60 = vld [vmem:[%s3015_s15 + $0x320] sm:$0xff]  }
  0x3c   : > { %2549 = vmatpush3.bf16.msra.mxu0 %v2829_v45  ;;  %956 = vmatmul.mubr.bf16.gmra.mrb[4].mxu1 %v2847_v61  ;;  %v2900_v45 = vld [vmem:[%s3051_s19 + $0x94] ss:$36 sps:$4 sm:$0xff]   ;;  %v2916_v61 = vld [vmem:[%s3015_s15 + $0x2e0] sm:$0xff]  }
  0x3d   : > { %2577 = vmatpush3.bf16.msra.mxu1 %v2831_v47  ;;  %2550 = vmatprep.subr.bf16.mxu0 %v2832_v48  ;;  %v2902_v47 = vld [vmem:[%s3015_s15 + $0x340] sm:$0xff]   ;;  %v2903_v48 = vld [vmem:[%s3015_s15 + $0x308] sm:$0xff]  }
  0x3e   : > { %2578 = vmatprep.subr.bf16.mxu1 %v2834_v50  ;;  %996 = vmatprep.mubr.bf16.mxu0 %v2859_v8  ;;  %v2905_v50 = vld [vmem:[%s3015_s15 + $0x388] sm:$0xff]   ;;  %v2928_v8 = vld [vmem:[%s3015_s15 + $0x3b0] sm:$0xff]  }
  0x3f   : > { %1045 = vmatprep.mubr.bf16.mxu1 %v2864_v12  ;;  %v2932_v12 = vld [vmem:[%s3015_s15 + $0x3b8] sm:$0xff]  }
  0x40   : > { %2551 = vmatpush3.bf16.msra.mxu0 %v2833_v49  ;;  %v2904_v49 = vld [vmem:[%s3015_s15 + $0x2c8] sm:$0xff]  }
  0x41   : > { %2579 = vmatpush3.bf16.msra.mxu1 %v2835_v51  ;;  %2552 = vmatprep.subr.bf16.mxu0 %v2836_v52  ;;  %v2906_v51 = vld [vmem:[%s3015_s15 + $0x348] sm:$0xff]   ;;  %v2907_v52 = vld [vmem:[%s3015_s15 + $0x310] sm:$0xff]  }
  0x42   : > { %2580 = vmatprep.subr.bf16.mxu1 %v2838_v54  ;;  %v2909_v54 = vld [vmem:[%s3015_s15 + $0x390] sm:$0xff]  }
  0x44   : > { %2553 = vmatpush3.bf16.msra.mxu0 %v2837_v53  ;;  %v2908_v53 = vld [vmem:[%s3015_s15 + $0x2d0] sm:$0xff]  }
  0x45   : > { %2581 = vmatpush3.bf16.msra.mxu1 %v2839_v55  ;;  %2554 = vmatprep.subr.bf16.mxu0 %v2840_v56  ;;  %v2910_v55 = vld [vmem:[%s3015_s15 + $0x350] sm:$0xff]   ;;  %v2911_v56 = vld [vmem:[%s3015_s15 + $0x318] sm:$0xff]  }
  0x46   : > { %2582 = vmatprep.subr.bf16.mxu1 %v2848_v62  ;;  %v2917_v62 = vld [vmem:[%s3015_s15 + $0x3a0] sm:$0xff]  }
  0x48   : > { %2555 = vmatpush3.bf16.msra.mxu0 %v2845_v59  ;;  %v2914_v59 = vld [vmem:[%s3015_s15 + $0x358] sm:$0xff]  }
  0x49   : > { %2583 = vmatpush3.bf16.msra.mxu1 %v2849_v63  ;;  %2556 = vmatprep.subr.bf16.mxu0 %v2850_v0  ;;  %v2918_v63 = vld [vmem:[%s3015_s15 + $0x360] sm:$0xff]   ;;  %v2919_v0 = vld [vmem:[%s3015_s15 + $0x328] sm:$0xff]  }
  0x4a   : > { %2584 = vmatprep.subr.bf16.mxu1 %v2852_v2  ;;  %v2921_v2 = vld [vmem:[%s3015_s15 + $0x3a8] sm:$0xff]  }
  0x4c   : > { %2557 = vmatpush3.bf16.msra.mxu0 %v2851_v1  ;;  %v2920_v1 = vld [vmem:[%s3015_s15 + $0x2e8] sm:$0xff]  }
  0x4d   : > { %2585 = vmatpush3.bf16.msra.mxu1 %v2853_v3  ;;  %2558 = vmatprep.subr.bf16.mxu0 %v2854_v4  ;;  %v2922_v3 = vld [vmem:[%s3015_s15 + $0x368] sm:$0xff]   ;;  %v2923_v4 = vld [vmem:[%s3015_s15 + $0x330] sm:$0xff]  }
  0x4e   : > { %2586 = vmatprep.subr.bf16.mxu1 %v2856_v6  ;;  %v2926_v6 = vld [vmem:[%s3015_s15 + $0x2f0] sm:$0xff]  }
  0x50   : > { %2559 = vmatpush3.bf16.msra.mxu0 %v2855_v5  ;;  %v2924_v5 = vld [vmem:[%s3051_s19 + $0xdc] ss:$36 sps:$4 sm:$0xff]  }
  0x51   : > { %2587 = vmatpush3.bf16.msra.mxu1 %v2860_v9  ;;  %2732 = vmatprep.subr.bf16.mxu0 %v2861_v10  ;;  %v2929_v9 = vld [vmem:[%s3015_s15 + $0x370] sm:$0xff]  }
  0x52   : > { %2610 = vmatprep.subr.bf16.mxu1 %v2865_v13  ;;  %v2933_v13 = vld [vmem:[%s3051_s19 + $0x98] ss:$36 sps:$4 sm:$0xff]  }
  0x53   : > { %997 = vmatmul.mubr.bf16.vlgmr.msra.gmra.mrb[8].mxu0 %v2857_v7  ;;  %v2927_v7 = vld [vmem:[%s3051_s19 + $0xd8] ss:$36 sps:$4 sm:$0xff]  }
  0x54   : > { %2733 = vmatpush3.bf16.msra.mxu0 %v2861_v10  ;;  %1046 = vmatmul.mubr.bf16.vlgmr.msra.gmra.mrb[8].mxu1 %v2862_v11  ;;  %v2930_v10 = vld [vmem:[%s3015_s15 + $0x338] sm:$0xff]  }
  0x55   : > { %2611 = vmatpush3.bf16.msra.mxu1 %v2866_v14  ;;  %2734 = vmatprep.subr.bf16.mxu0 %v2867_v15  ;;  %v2931_v11 = vld [vmem:[%s3015_s15 + $0x2f8] sm:$0xff]  }
  0x56   : > { %2612 = vmatprep.subr.bf16.mxu1 %v2868_v16  ;;  %1004 = vmatprep.mubr.bf16.mxu0 %v2869_v17  ;;  %v2935_v14 = vld [vmem:[%s3051_s19 + $0x9c] ss:$36 sps:$4 sm:$0xff]  }
  0x57   : > { %1053 = vmatprep.mubr.bf16.mxu1 %v2874_v21  ;;  %v2937_v16 = vld [vmem:[%s3015_s15 + $0x400] sm:$0xff]  }
  0x58   : > { %2735 = vmatpush3.bf16.msra.mxu0 %v2867_v15  ;;  %v2936_v15 = vld [vmem:[%s3015_s15 + $0x378] sm:$0xff]   ;;  %v2938_v17 = vld [vmem:[%s3051_s19 + $0xa0] ss:$36 sps:$4 sm:$0xff]  }
  0x59   : > { %2613 = vmatpush3.bf16.msra.mxu1 %v2871_v18  ;;  %2736 = vmatprep.subr.bf16.mxu0 %v2873_v20  ;;  %v2940_v18 = vld [vmem:[%s3051_s19 + $0xa4] ss:$36 sps:$4 sm:$0xff]  }
  0x5a   : > { %2614 = vmatprep.subr.bf16.mxu1 %v2877_v23  ;;  %v2943_v21 = vld [vmem:[%s3015_s15 + $0x440] sm:$0xff]  }
  0x5b   : > { %1005 = vmatmul.mubr.bf16.gmra.mrb[12].mxu0 %v2872_v19  ;;  %v2941_v19 = vld [vmem:[%s3015_s15 + $0x3c0] sm:$0xff]  }
  0x5c   : > { %2737 = vmatpush3.bf16.msra.mxu0 %v2873_v20  ;;  %1054 = vmatmul.mubr.bf16.gmra.mrb[12].mxu1 %v2876_v22  ;;  %v2942_v20 = vld [vmem:[%s3015_s15 + $0x408] sm:$0xff]  }
  0x5d   : > { %2615 = vmatpush3.bf16.msra.mxu1 %v2878_v24  ;;  %2738 = vmatprep.subr.bf16.mxu0 %v2879_v25  ;;  %v2944_v22 = vld [vmem:[%s3015_s15 + $0x3c8] sm:$0xff]   ;;  %v2947_v24 = vld [vmem:[%s3051_s19 + $0xe0] ss:$36 sps:$4 sm:$0xff]  }
  0x5e   : > { %2616 = vmatprep.subr.bf16.mxu1 %v2880_v26  ;;  %2748 = vmatprep.mubr.bf16.mxu0 %v2893_v39  ;;  %v2945_v23 = vld [vmem:[%s3051_s19 + $0xe4] ss:$36 sps:$4 sm:$0xff]   ;;  %v2963_v39 = vld [vmem:[%s3015_s15 + $0x430] sm:$0xff]  }
  0x5f   : > { %1837 = vmatprep.mubr.bf16.mxu1 %v2900_v45  ;;  %v2949_v26 = vld [vmem:[%s3015_s15 + $0x448] sm:$0xff]  }
  0x60   : > { %2739 = vmatpush3.bf16.msra.mxu0 %v2879_v25  ;;  %v2948_v25 = vld [vmem:[%s3015_s15 + $0x410] sm:$0xff]  }
  0x61   : > { %2617 = vmatpush3.bf16.msra.mxu1 %v2881_v27  ;;  %2740 = vmatprep.subr.bf16.mxu0 %v2882_v28  ;;  %v2950_v27 = vld [vmem:[%s3051_s19 + $0xec] ss:$36 sps:$4 sm:$0xff]  }
  0x62   : > { %2618 = vmatprep.subr.bf16.mxu1 %v2883_v29  ;;  %v2953_v29 = vld [vmem:[%s3051_s19 + $0xe8] ss:$36 sps:$4 sm:$0xff]  }
  0x63   : > { %v2971_v45 = vld [vmem:[%s3051_s19 + $0xac] ss:$36 sps:$4 sm:$0xff]  }
  0x64   : > { %2741 = vmatpush3.bf16.msra.mxu0 %v2882_v28  ;;  %v2952_v28 = vld [vmem:[%s3015_s15 + $0x3d0] sm:$0xff]  }
  0x65   : > { %2742 = vmatprep.subr.bf16.mxu0 %v2885_v31  ;;  %2619 = vmatpush3.bf16.msra.mxu1 %v2884_v30  ;;  %v2954_v30 = vld [vmem:[%s3015_s15 + $0x418] sm:$0xff]  }
  0x66   : > { %2620 = vmatprep.subr.bf16.mxu1 %v2886_v32  ;;  %v2956_v32 = vld [vmem:[%s3015_s15 + $0x3d8] sm:$0xff]  }
  0x68   : > { %2743 = vmatpush3.bf16.msra.mxu0 %v2885_v31  ;;  %v2955_v31 = vld [vmem:[%s3015_s15 + $0x450] sm:$0xff]  }
  0x69   : > { %2744 = vmatprep.subr.bf16.mxu0 %v2888_v34  ;;  %2621 = vmatpush3.bf16.msra.mxu1 %v2887_v33  ;;  %v2957_v33 = vld [vmem:[%s3015_s15 + $0x420] sm:$0xff]  }
  0x6a   : > { %2622 = vmatprep.subr.bf16.mxu1 %v2889_v35  ;;  %v2959_v35 = vld [vmem:[%s3015_s15 + $0x3e0] sm:$0xff]  }
  0x6c   : > { %2745 = vmatpush3.bf16.msra.mxu0 %v2888_v34  ;;  %v2958_v34 = vld [vmem:[%s3015_s15 + $0x458] sm:$0xff]  }
  0x6d   : > { %2746 = vmatprep.subr.bf16.mxu0 %v2891_v37  ;;  %2623 = vmatpush3.bf16.msra.mxu1 %v2890_v36  ;;  %v2960_v36 = vld [vmem:[%s3015_s15 + $0x428] sm:$0xff]  }
  0x6e   : > { %2624 = vmatprep.subr.bf16.mxu1 %v2892_v38  ;;  %v2962_v38 = vld [vmem:[%s3015_s15 + $0x3e8] sm:$0xff]  }
  0x70   : > { %2747 = vmatpush3.bf16.msra.mxu0 %v2891_v37  ;;  %v2961_v37 = vld [vmem:[%s3015_s15 + $0x460] sm:$0xff]  }
  0x71   : > { %2638 = vmatprep.subr.bf16.mxu0 %v2896_v42  ;;  %2625 = vmatpush3.bf16.msra.mxu1 %v2894_v40  ;;  %v2964_v40 = vld [vmem:[%s3015_s15 + $0x468] sm:$0xff]   ;;  %v2967_v42 = vld [vmem:[%s3015_s15 + $0x470] sm:$0xff]  }
  0x72   : > { %2666 = vmatprep.subr.bf16.mxu1 %v2901_v46  ;;  %v2972_v46 = vld [vmem:[%s3015_s15 + $0x478] sm:$0xff]  }
  0x73   : > { %2749 = vmatmul.mubr.bf16.vlgmr.msra.gmra.mrb[16].mxu0 %v2895_v41  ;;  %v2965_v41 = vld [vmem:[%s3015_s15 + $0x3f0] sm:$0xff]  }
  0x74   : > { %2639 = vmatpush3.bf16.msra.mxu0 %v2897_v43  ;;  %1838 = vmatmul.mubr.bf16.vlgmr.msra.gmra.mrb[16].mxu1 %v2898_v44  ;;  %v2966_v43 = vld [vmem:[%s3015_s15 + $0x438] sm:$0xff]  }
  0x75   : > { %2640 = vmatprep.subr.bf16.mxu0 %v2903_v48  ;;  %2667 = vmatpush3.bf16.msra.mxu1 %v2902_v47  ;;  %v2968_v44 = vld [vmem:[%s3015_s15 + $0x3f8] sm:$0xff]   ;;  %v2973_v47 = vld [vmem:[%s3051_s19 + $0xb0] ss:$36 sps:$4 sm:$0xff]   ;;  %v2969_v48 = vld [vmem:[%s3051_s19 + $0xa8] ss:$36 sps:$4 sm:$0xff]  }
  0x76   : > { %2668 = vmatprep.subr.bf16.mxu1 %v2905_v50  ;;  %1845 = vmatprep.mubr.bf16.mxu1 %v2924_v5  ;;  %v2974_v50 = vld [vmem:[%s3051_s19 + $0xf8] ss:$36 sps:$4 sm:$0xff]  }
  0x77   : > { %1886 = vmatprep.mubr.bf16.mxu0 %v2935_v14 }
  0x78   : > { %2641 = vmatpush3.bf16.msra.mxu0 %v2904_v49  ;;  %v2975_v49 = vld [vmem:[%s3051_s19 + $0xf4] ss:$36 sps:$4 sm:$0xff]  }
  0x79   : > { %2642 = vmatprep.subr.bf16.mxu0 %v2907_v52  ;;  %2669 = vmatpush3.bf16.msra.mxu1 %v2906_v51  ;;  %v2977_v51 = vld [vmem:[%s3051_s19 + $0xf0] ss:$36 sps:$4 sm:$0xff]  }
  0x7a   : > { %2670 = vmatprep.subr.bf16.mxu1 %v2909_v54 }
  0x7c   : > { %2643 = vmatpush3.bf16.msra.mxu0 %v2908_v53  ;;  %1846 = vmatmul.mubr.bf16.gmra.mrb[20].mxu1 %v2927_v7 }
  0x7d   : > { %2644 = vmatprep.subr.bf16.mxu0 %v2911_v56  ;;  %2671 = vmatpush3.bf16.msra.mxu1 %v2910_v55 }
  0x7e   : > { %2672 = vmatprep.subr.bf16.mxu1 %v2913_v58  ;;  %1935 = vmatprep.mubr.bf16.mxu1 %v2940_v18 }
  0x80   : > { %2645 = vmatpush3.bf16.msra.mxu0 %v2912_v57 }
  0x81   : > { %2646 = vmatprep.subr.bf16.mxu0 %v2915_v60  ;;  %2673 = vmatpush3.bf16.msra.mxu1 %v2914_v59 }
  0x82   : > { %2674 = vmatprep.subr.bf16.mxu1 %v2917_v62 }
  0x84   : > { %2647 = vmatpush3.bf16.msra.mxu0 %v2916_v61 }
  0x85   : > { %2648 = vmatprep.subr.bf16.mxu0 %v2919_v0  ;;  %2675 = vmatpush3.bf16.msra.mxu1 %v2918_v63 }
  0x86   : > { %2676 = vmatprep.subr.bf16.mxu1 %v2921_v2 }
  0x88   : > { %2649 = vmatpush3.bf16.msra.mxu0 %v2920_v1 }
  0x89   : > { %2650 = vmatprep.subr.bf16.mxu0 %v2923_v4  ;;  %2677 = vmatpush3.bf16.msra.mxu1 %v2922_v3 }
  0x8a   : > { %2678 = vmatprep.subr.bf16.mxu1 %v2928_v8 }
  0x8c   : > { %2651 = vmatpush3.bf16.msra.mxu0 %v2926_v6 }
  0x8d   : > { %2679 = vmatpush3.bf16.msra.mxu1 %v2929_v9  ;;  %2652 = vmatprep.subr.bf16.mxu0 %v2930_v10 }
  0x8e   : > { %2680 = vmatprep.subr.bf16.mxu1 %v2932_v12 }
  0x90   : > { %2653 = vmatpush3.bf16.msra.mxu0 %v2931_v11 }
  0x91   : > { %2681 = vmatpush3.bf16.msra.mxu1 %v2936_v15  ;;  %2694 = vmatprep.subr.bf16.mxu0 %v2937_v16 }
  0x92   : > { %2752 = vmatprep.subr.bf16.mxu1 %v2943_v21 }
  0x93   : > { %1887 = vmatmul.mubr.bf16.vlgmr.msra.gmra.mrb[20].mxu0 %v2933_v13 }
  0x94   : > { %2695 = vmatpush3.bf16.msra.mxu0 %v2941_v19  ;;  %1936 = vmatmul.mubr.bf16.vlgmr.msra.gmra.mrb[24].mxu1 %v2938_v17 }
  0x95   : > { %2696 = vmatprep.subr.bf16.mxu0 %v2942_v20  ;;  %2753 = vmatpush3.bf16.msra.mxu1 %v2943_v21 }
  0x96   : > { %1894 = vmatprep.mubr.bf16.mxu0 %v2945_v23  ;;  %2754 = vmatprep.subr.bf16.mxu1 %v2949_v26 }
  0x97   : > { %1943 = vmatprep.mubr.bf16.mxu1 %v2950_v27 }
  0x98   : > { %2697 = vmatpush3.bf16.msra.mxu0 %v2944_v22 }
  0x99   : > { %2698 = vmatprep.subr.bf16.mxu0 %v2948_v25  ;;  %2755 = vmatpush3.bf16.msra.mxu1 %v2949_v26 }
  0x9a   : > { %2756 = vmatprep.subr.bf16.mxu1 %v2955_v31 }
  0x9b   : > { %1895 = vmatmul.mubr.bf16.gmra.mrb[24].mxu0 %v2947_v24 }
  0x9c   : > { %2699 = vmatpush3.bf16.msra.mxu0 %v2952_v28  ;;  %1944 = vmatmul.mubr.bf16.gmra.mrb[28].mxu1 %v2953_v29 }
  0x9d   : > { %2700 = vmatprep.subr.bf16.mxu0 %v2954_v30  ;;  %2757 = vmatpush3.bf16.msra.mxu1 %v2955_v31 }
  0x9e   : > { %2758 = vmatprep.subr.bf16.mxu1 %v2958_v34  ;;  %1984 = vmatprep.mubr.bf16.mxu0 %v2971_v45 }
  0x9f   : > { %2768 = vmatprep.mubr.bf16.mxu1 %v2973_v47 }
  0xa0   : > { %2701 = vmatpush3.bf16.msra.mxu0 %v2956_v32 }
  0xa1   : > { %2702 = vmatprep.subr.bf16.mxu0 %v2957_v33  ;;  %2759 = vmatpush3.bf16.msra.mxu1 %v2958_v34 }
  0xa2   : > { %2760 = vmatprep.subr.bf16.mxu1 %v2961_v37 }
  0xa4   : > { %2703 = vmatpush3.bf16.msra.mxu0 %v2959_v35 }
  0xa5   : > { %2704 = vmatprep.subr.bf16.mxu0 %v2960_v36  ;;  %2761 = vmatpush3.bf16.msra.mxu1 %v2961_v37 }
  0xa6   : > { %2762 = vmatprep.subr.bf16.mxu1 %v2964_v40 }
  0xa8   : > { %2705 = vmatpush3.bf16.msra.mxu0 %v2962_v38 }
  0xa9   : > { %2706 = vmatprep.subr.bf16.mxu0 %v2963_v39  ;;  %2763 = vmatpush3.bf16.msra.mxu1 %v2964_v40 }
  0xaa   : > { %2764 = vmatprep.subr.bf16.mxu1 %v2967_v42 }
  0xac   : > { %2707 = vmatpush3.bf16.msra.mxu0 %v2965_v41 }
  0xad   : > { %2708 = vmatprep.subr.bf16.mxu0 %v2966_v43  ;;  %2765 = vmatpush3.bf16.msra.mxu1 %v2967_v42 }
  0xae   : > { %2766 = vmatprep.subr.bf16.mxu1 %v2972_v46 }
  0xb0   : > { %2709 = vmatpush3.bf16.msra.mxu0 %v2968_v44 }
  0xb1   : > { %2767 = vmatpush3.bf16.msra.mxu1 %v2972_v46 }
  0xb3   : > { %1985 = vmatmul.mubr.bf16.vlgmr.msra.gmra.mrb[28].mxu0 %v2969_v48 }
  0xb4   : > { %1992 = vmatprep.mubr.bf16.mxu0 %v2975_v49  ;;  %2769 = vmatmul.mubr.bf16.vlgmr.msra.gmra.mrb[32].mxu1 %v2974_v50 }
  0xbb   : > { %1993 = vmatmul.mubr.bf16.gmra.mrb[32].mxu0 %v2977_v51 }
 0x106   : > { %v2504_v52 = vpop.f32.mrb[0].mxu0 }
 0x107   : > { %v2532_v53 = vpop.f32.mrb[0].mxu1  ;;  %v2505_v54 = vpop.f32.mrb[1].mxu0 }
 0x108   : > { %v2506_v55 = vadd.f32 %v2505_v54, %v2504_v52  ;;  %v2533_v56 = vpop.f32.mrb[1].mxu1  ;;  %v2507_v57 = vpop.f32.mrb[2].mxu0 }
 0x109   : > { %v2534_v58 = vadd.f32 %v2533_v56, %v2532_v53  ;;  %v2535_v59 = vpop.f32.mrb[2].mxu1  ;;  %v2508_v60 = vpop.f32.mrb[3].mxu0 }
 0x10a   : > { %v2509_v61 = vadd.f32 %v2508_v60, %v2507_v57  ;;  %v2536_v62 = vpop.f32.mrb[3].mxu1 }
 0x10b   : > { %v950_v63 = vadd.f32 %v2534_v58, %v2506_v55  ;;  %v2537_v0 = vadd.f32 %v2536_v62, %v2535_v59 }
 0x10d   : > { %v953_v1 = vadd.f32 %v2537_v0, %v2509_v61 }
 0x10e   : > { %v2510_v2 = vpop.f32.mrb[4].mxu0 }
 0x10f   : > { %v2538_v3 = vpop.f32.mrb[4].mxu1  ;;  %v2511_v4 = vpop.f32.mrb[5].mxu0 }
 0x110   : > { %v2539_v5 = vpop.f32.mrb[5].mxu1  ;;  %v2512_v6 = vadd.f32 %v2511_v4, %v2510_v2  ;;  %v2513_v8 = vpop.f32.mrb[6].mxu0 }
 0x111   : > { %v2540_v7 = vadd.f32 %v2539_v5, %v2538_v3  ;;  %v2541_v9 = vpop.f32.mrb[6].mxu1  ;;  %v2514_v10 = vpop.f32.mrb[7].mxu0 }
 0x112   : > { %v2542_v11 = vpop.f32.mrb[7].mxu1  ;;  %v2515_v13 = vadd.f32 %v2514_v10, %v2513_v8 }
 0x113   : > { %v958_v12 = vadd.f32 %v2540_v7, %v2512_v6  ;;  %v2543_v14 = vadd.f32 %v2542_v11, %v2541_v9 }
 0x115   : > { %v961_v15 = vadd.f32 %v2543_v14, %v2515_v13 }
 0x126   : > { %v2560_v16 = vpop.f32.mrb[8].mxu0 }
 0x127   : > { %v2561_v17 = vpop.f32.mrb[9].mxu0  ;;  %v2588_v20 = vpop.f32.mrb[8].mxu1 }
 0x128   : > { %v2562_v18 = vadd.f32 %v2561_v17, %v2560_v16  ;;  %v2563_v19 = vpop.f32.mrb[10].mxu0  ;;  %v2589_v24 = vpop.f32.mrb[9].mxu1 }
 0x129   : > { %v2564_v21 = vpop.f32.mrb[11].mxu0  ;;  %v2590_v25 = vadd.f32 %v2589_v24, %v2588_v20  ;;  %v2591_v26 = vpop.f32.mrb[10].mxu1 }
 0x12a   : > { %v999_v22 = vadd.f32 %v2562_v18, %v950_v63  ;;  %v2565_v23 = vadd.f32 %v2564_v21, %v2563_v19  ;;  %v2592_v28 = vpop.f32.mrb[11].mxu1 }
 0x12b   : > { %v2593_v29 = vadd.f32 %v2592_v28, %v2591_v26 }
 0x12c   : > { %v1002_v27 = vadd.f32 %v2565_v23, %v953_v1  ;;  %v1048_v30 = vadd.f32 %v2590_v25, %v999_v22 }
 0x12e   : > { %v2566_v31 = vpop.f32.mrb[12].mxu0  ;;  %v1051_v32 = vadd.f32 %v2593_v29, %v1002_v27 }
 0x12f   : > { %v2567_v33 = vpop.f32.mrb[13].mxu0  ;;  %v2594_v36 = vpop.f32.mrb[12].mxu1 }
 0x130   : > { %v2568_v34 = vadd.f32 %v2567_v33, %v2566_v31  ;;  %v2569_v35 = vpop.f32.mrb[14].mxu0  ;;  %v2595_v40 = vpop.f32.mrb[13].mxu1 }
 0x131   : > { %v2570_v37 = vpop.f32.mrb[15].mxu0  ;;  %v2596_v41 = vadd.f32 %v2595_v40, %v2594_v36  ;;  %v2597_v42 = vpop.f32.mrb[14].mxu1 }
 0x132   : > { %v1007_v38 = vadd.f32 %v2568_v34, %v958_v12  ;;  %v2571_v39 = vadd.f32 %v2570_v37, %v2569_v35  ;;  %v2598_v44 = vpop.f32.mrb[15].mxu1 }
 0x133   : > { %v2599_v45 = vadd.f32 %v2598_v44, %v2597_v42 }
 0x134   : > { %v1010_v43 = vadd.f32 %v2571_v39, %v961_v15  ;;  %v1056_v46 = vadd.f32 %v2596_v41, %v1007_v38 }
 0x136   : > { %v1059_v47 = vadd.f32 %v2599_v45, %v1010_v43 }
 0x146   : > { %v2750_v48 = vpop.f32.mrb[16].mxu0 }
 0x147   : > { %v1105_v49 = vadd.f32 %v2750_v48, %v1056_v46  ;;  %v1096_v50 = vpop.f32.mrb[17].mxu0  ;;  %v2626_v53 = vpop.f32.mrb[16].mxu1 }
 0x148   : > { %v1097_v51 = vadd.f32 %v1096_v50, %v1048_v30  ;;  %v2751_v52 = vpop.f32.mrb[18].mxu0  ;;  %v2627_v56 = vpop.f32.mrb[17].mxu1 }
 0x149   : > { %1113 = vst [vmem:[%s3207_s23 + $0x10] sm:$0xff] %v1105_v49  ;;  %v1108_v54 = vadd.f32 %v2751_v52, %v1059_v47  ;;  %v1099_v55 = vpop.f32.mrb[19].mxu0  ;;  %v2628_v58 = vadd.f32 %v2627_v56, %v2626_v53  ;;  %v2629_v59 = vpop.f32.mrb[18].mxu1 }
 0x14a   : > { %1111 = vst [vmem:[%s3207_s23] sm:$0xff] %v1097_v51  ;;  %v1100_v57 = vadd.f32 %v1099_v55, %v1051_v32  ;;  %v2630_v60 = vpop.f32.mrb[19].mxu1 }
 0x14b   : > { %1114 = vst [vmem:[%s3207_s23 + $0x18] sm:$0xff] %v1108_v54  ;;  %v2631_v61 = vadd.f32 %v2630_v60, %v2629_v59 }
 0x14c   : > { %1112 = vst [vmem:[%s3207_s23 + $0x8] sm:$0xff] %v1100_v57 }
 0x14f   : > { %v2632_v62 = vpop.f32.mrb[20].mxu1 }
 0x150   : > { %v2633_v63 = vpop.f32.mrb[21].mxu1 }
 0x151   : > { %v2634_v0 = vadd.f32 %v2633_v63, %v2632_v62  ;;  %v2635_v1 = vpop.f32.mrb[22].mxu1 }
 0x152   : > { %v2636_v2 = vpop.f32.mrb[23].mxu1 }
 0x153   : > { %v2637_v3 = vadd.f32 %v2636_v2, %v2635_v1 }
 0x166   : > { %v2654_v4 = vpop.f32.mrb[20].mxu0 }
 0x167   : > { %v2655_v5 = vpop.f32.mrb[21].mxu0  ;;  %v2682_v8 = vpop.f32.mrb[24].mxu1 }
 0x168   : > { %v2656_v6 = vadd.f32 %v2655_v5, %v2654_v4  ;;  %v2657_v7 = vpop.f32.mrb[22].mxu0  ;;  %v2683_v12 = vpop.f32.mrb[25].mxu1 }
 0x169   : > { %v2658_v9 = vpop.f32.mrb[23].mxu0  ;;  %v2684_v13 = vadd.f32 %v2683_v12, %v2682_v8  ;;  %v2685_v14 = vpop.f32.mrb[26].mxu1 }
 0x16a   : > { %v1889_v10 = vadd.f32 %v2656_v6, %v2628_v58  ;;  %v2659_v11 = vadd.f32 %v2658_v9, %v2657_v7  ;;  %v2686_v16 = vpop.f32.mrb[27].mxu1 }
 0x16b   : > { %v2687_v18 = vadd.f32 %v2686_v16, %v2685_v14 }
 0x16c   : > { %v1892_v15 = vadd.f32 %v2659_v11, %v2631_v61  ;;  %v1938_v17 = vadd.f32 %v2684_v13, %v1889_v10 }
 0x16e   : > { %v2660_v19 = vpop.f32.mrb[24].mxu0  ;;  %v1941_v20 = vadd.f32 %v2687_v18, %v1892_v15 }
 0x16f   : > { %v2661_v21 = vpop.f32.mrb[25].mxu0  ;;  %v2688_v26 = vpop.f32.mrb[28].mxu1 }
 0x170   : > { %v2662_v22 = vadd.f32 %v2661_v21, %v2660_v19  ;;  %v2663_v23 = vpop.f32.mrb[26].mxu0  ;;  %v2689_v28 = vpop.f32.mrb[29].mxu1 }
 0x171   : > { %v2664_v24 = vpop.f32.mrb[27].mxu0  ;;  %v2690_v30 = vadd.f32 %v2689_v28, %v2688_v26  ;;  %v2691_v31 = vpop.f32.mrb[30].mxu1 }
 0x172   : > { %v1897_v25 = vadd.f32 %v2662_v22, %v2634_v0  ;;  %v2665_v27 = vadd.f32 %v2664_v24, %v2663_v23  ;;  %v2692_v32 = vpop.f32.mrb[31].mxu1 }
 0x173   : > { %v2693_v34 = vadd.f32 %v2692_v32, %v2691_v31 }
 0x174   : > { %v1900_v29 = vadd.f32 %v2665_v27, %v2637_v3  ;;  %v1946_v33 = vadd.f32 %v2690_v30, %v1897_v25 }
 0x176   : > { %v1949_v35 = vadd.f32 %v2693_v34, %v1900_v29 }
 0x186   : > { %v2710_v36 = vpop.f32.mrb[28].mxu0 }
 0x187   : > { %v2711_v37 = vpop.f32.mrb[29].mxu0  ;;  %v2770_v41 = vpop.f32.mrb[32].mxu1 }
 0x188   : > { %v2712_v38 = vadd.f32 %v2711_v37, %v2710_v36  ;;  %v2713_v39 = vpop.f32.mrb[30].mxu0  ;;  %v2035_v44 = vpop.f32.mrb[33].mxu1 }
 0x189   : > { %v2714_v40 = vpop.f32.mrb[31].mxu0  ;;  %v2771_v45 = vpop.f32.mrb[34].mxu1 }
 0x18a   : > { %v2715_v42 = vadd.f32 %v2714_v40, %v2713_v39  ;;  %v1987_v43 = vadd.f32 %v2712_v38, %v1938_v17  ;;  %v2038_v48 = vpop.f32.mrb[35].mxu1 }
 0x18c   : > { %v2036_v46 = vadd.f32 %v2035_v44, %v1987_v43  ;;  %v1990_v47 = vadd.f32 %v2715_v42, %v1941_v20 }
 0x18e   : > { %2481 = vst [vmem:[%s3207_s23 + $0x20] sm:$0xff] %v2036_v46  ;;  %v2039_v49 = vadd.f32 %v2038_v48, %v1990_v47  ;;  %v2716_v50 = vpop.f32.mrb[32].mxu0 }
 0x18f   : > { %v2717_v51 = vpop.f32.mrb[33].mxu0 }
 0x190   : > { %2482 = vst [vmem:[%s3207_s23 + $0x28] sm:$0xff] %v2039_v49  ;;  %v2718_v52 = vadd.f32 %v2717_v51, %v2716_v50  ;;  %v2719_v53 = vpop.f32.mrb[34].mxu0 }
 0x191   : > { %v2720_v54 = vpop.f32.mrb[35].mxu0 }
 0x192   : > { %v1995_v55 = vadd.f32 %v2718_v52, %v1946_v33  ;;  %v2721_v56 = vadd.f32 %v2720_v54, %v2719_v53 }
 0x194   : > { %v2044_v57 = vadd.f32 %v2770_v41, %v1995_v55  ;;  %v1998_v58 = vadd.f32 %v2721_v56, %v1949_v35 }
 0x196   : > { %2483 = vst [vmem:[%s3207_s23 + $0x30] sm:$0xff] %v2044_v57  ;;  %v2047_v59 = vadd.f32 %v2771_v45, %v1998_v58 }
 0x198   : > { %2484 = vst [vmem:[%s3207_s23 + $0x38] sm:$0xff] %v2047_v59 }
 0x199 PF: > { %s12_s9 = sadd.s32 1, %s2984_s9  }
 0x19a   : > { %p9_p4 = scmp.ge.s32.totalorder %s12_s9, 4  }
 0x19c   :  { %11 = sbr.rel (!%p9_p4) target bundleno = 1 (0x1), region = 64 }

</bundles_post_ra>
